<compile_context>
chip_gen: v6e
topology: v6e:2x2x1
jax: 0.10.0
libtpu: 0.0.40
codegen_flags: <defaults>
</compile_context>

<pallas_src>
import jax
import jax.numpy as jnp
from jax.experimental import pallas as pl
from jax.experimental.pallas import tpu as pltpu

_LANES = 128
_SUBLANES = 8


def _round_up(x, m):
    return ((x + m - 1) // m) * m


def _sublane_multiple(dtype):
    """Minimum second-minor tile rows: f32 -> 8, bf16/f16 -> 16, int8/bool -> 32."""
    itemsize = max(1, jnp.dtype(dtype).itemsize)
    return max(_SUBLANES, 32 // itemsize)


def _tpu_tuning():
    """(max block rows, # 'parallel' grid splits) tuned per TPU generation."""
    kind = ""
    try:
        dev = jax.devices()[0]
        if dev.platform == "tpu":
            kind = dev.device_kind.lower()
    except Exception:
        pass
    is_v7 = ("v7" in kind) or ("tpu7" in kind) or ("7x" in kind)
    is_v6 = "v6" in kind
    # 8192 rows f32 = 4 MiB per stream per buffer -> 16 MiB double-buffered:
    # fits the 32 MiB scoped-VMEM default on v6e/v7x.  v5e (16 MiB default)
    # and unknown chips get 4096 rows (8 MiB of buffers), no override needed.
    max_rows = 8192 if (is_v7 or is_v6) else 4096
    # The leading "parallel" split only pays off on 2-TensorCore v7x; on
    # single-TC chips it just adds an extra resident output block.
    splits = 2 if is_v7 else 1
    return max_rows, splits


def _bce_with_logits(x, t):
    # Numerically-stable BCE with logits (same form torch uses):
    #   max(x, 0) - x*t + log1p(exp(-|x|))
    return jnp.maximum(x, 0.0) - x * t + jnp.log1p(jnp.exp(-jnp.abs(x)))


def _focal_from_mean_bce(mean_bce, alpha, gamma):
    bce_exp = jnp.exp(-mean_bce)
    return jnp.float32(alpha) * (1.0 - bce_exp) ** jnp.float32(gamma) * mean_bce


def _focal_loss_fallback(x, t, alpha, gamma):
    """Pure-JAX path (tiny inputs) and correctness reference."""
    xf = jnp.reshape(x, (-1,)).astype(jnp.float32)
    tf = jnp.reshape(t, (-1,)).astype(jnp.float32)
    return _focal_from_mean_bce(jnp.mean(_bce_with_logits(xf, tf)), alpha, gamma)


def _make_sum_kernel(block_rows, blocks_per_split, rows_total, need_mask):
    """Kernel: accumulate per-element BCE into a resident (8,128) f32 block."""

    def kernel(x_ref, t_ref, o_ref):
        b = pl.program_id(1)

        @pl.when(b == 0)
        def _():
            o_ref[...] = jnp.zeros_like(o_ref)

        x = x_ref[...].astype(jnp.float32)
        t = t_ref[...].astype(jnp.float32)
        bce = _bce_with_logits(x, t)

        if need_mask:
            # Ragged final row-block (and any fully-overhanging split block):
            # select, not multiply, so garbage/NaN in the OOB rows cannot leak.
            g = pl.program_id(0) * blocks_per_split + b
            rows_valid = rows_total - g * block_rows
            row_ids = jax.lax.broadcasted_iota(jnp.int32, bce.shape, 0)
            bce = jnp.where(row_ids < rows_valid, bce, 0.0)

        if block_rows % _SUBLANES == 0:
            # Whole-vreg (VPU-only) reduction into the resident accumulator.
            o_ref[0] += bce.reshape(-1, _SUBLANES, _LANES).sum(axis=0)
        else:
            # Tiny whole-array block with <8 rows: one-off sublane reduce.
            o_ref[0, 0] += bce.sum(axis=0)

    return kernel


def focal_loss(inputs, targets, alpha=0.8, gamma=2.0, smooth=1.0, *,
               min_pallas_elements=65536):
    """Pallas TPU implementation of FocalLoss.forward (smooth is unused,
    exactly as in the reference PyTorch module)."""
    del smooth  # unused in the PyTorch forward as well

    x = jnp.reshape(inputs, (-1,))
    t = jnp.reshape(targets, (-1,))
    n = x.shape[0]

    rows_main = n // _LANES
    if n == 0 or rows_main == 0 or n < min_pallas_elements:
        # Launch overhead dominates for tiny inputs; pure JAX is faster.
        return _focal_loss_fallback(x, t, alpha, gamma)

    max_rows, splits = _tpu_tuning()
    mult = max(_sublane_multiple(x.dtype), _sublane_multiple(t.dtype))

    if rows_main >= mult:
        # Largest tile-aligned block <= max_rows; never larger than the array.
        block_rows = min(max_rows, (rows_main // mult) * mult)
    else:
        block_rows = rows_main  # whole (tiny) array as one full-dim block

    blocks_total = pl.cdiv(rows_main, block_rows)
    splits = max(1, min(splits, blocks_total))
    blocks_per_split = pl.cdiv(blocks_total, splits)
    need_mask = (splits * blocks_per_split * block_rows != rows_main)

    n_main = rows_main * _LANES
    # Identity slice + metadata reshape when 128 | n (common case): zero extra
    # HBM traffic.  Otherwise XLA materializes the prefix once (rare case).
    x2 = x[:n_main].reshape(rows_main, _LANES)
    t2 = t[:n_main].reshape(rows_main, _LANES)

    last_block = blocks_total - 1
    if splits * blocks_per_split != blocks_total:
        # Clamp fully-overhanging split blocks to a valid block; the in-kernel
        # mask (rows_valid <= 0) zeroes their contribution.
        def in_index(s, b):
            return (jnp.minimum(s * blocks_per_split + b, last_block), 0)
    else:
        def in_index(s, b):
            return (s * blocks_per_split + b, 0)

    kernel = _make_sum_kernel(block_rows, blocks_per_split, rows_main, need_mask)

    partials = pl.pallas_call(
        kernel,
        out_shape=jax.ShapeDtypeStruct((splits, _SUBLANES, _LANES), jnp.float32),
        grid_spec=pltpu.PrefetchScalarGridSpec(
            num_scalar_prefetch=0,
            grid=(splits, blocks_per_split),
            in_specs=[
                pl.BlockSpec((block_rows, _LANES), in_index),
                pl.BlockSpec((block_rows, _LANES), in_index),
            ],
            out_specs=pl.BlockSpec((1, _SUBLANES, _LANES), lambda s, b: (s, 0, 0)),
        ),
        compiler_params=pltpu.CompilerParams(
            dimension_semantics=("parallel", "arbitrary")
        ),
    )(x2, t2)

    total = jnp.sum(partials)

    n_tail = n - n_main
    if n_tail:
        # <128 leftover elements: negligible plain-JAX work.
        xt = x[n_main:].astype(jnp.float32)
        tt = t[n_main:].astype(jnp.float32)
        total = total + jnp.sum(_bce_with_logits(xt, tt))

    mean_bce = total / jnp.float32(n)
    return _focal_from_mean_bce(mean_bce, alpha, gamma)


if __name__ == "__main__":
    key = jax.random.PRNGKey(0)
    k1, k2, k3, k4 = jax.random.split(key, 4)

    # Case 1: NCHW logits / binary targets, element count divisible by 128
    # (zero-copy path, no masking).  Forced through the Pallas kernel.
    B, C, H, W = 2, 4, 16, 16
    x1 = jax.random.normal(k1, (B, C, H, W), dtype=jnp.float32)
    t1 = (jax.random.uniform(k2, (B, C, H, W)) > 0.5).astype(jnp.float32)
    out1 = jax.block_until_ready(focal_loss(x1, t1, min_pallas_elements=0))
    ref1 = _focal_loss_fallback(x1, t1, 0.8, 2.0)
    assert jnp.allclose(out1, ref1, rtol=1e-5, atol=1e-6), (out1, ref1)

    # Case 2: odd element count (2*4*17*19 = 2584): exercises the ragged
    # row-block mask, multi-block accumulation and the plain-JAX tail.
    x2 = jax.random.normal(k3, (2, 4, 17, 19), dtype=jnp.float32)
    t2 = (jax.random.uniform(k4, (2, 4, 17, 19)) > 0.5).astype(jnp.float32)
    out2 = jax.block_until_ready(focal_loss(x2, t2, min_pallas_elements=0))
    ref2 = _focal_loss_fallback(x2, t2, 0.8, 2.0)
    assert jnp.allclose(out2, ref2, rtol=1e-5, atol=1e-6), (out2, ref2)

    # Case 3: default auto path for small inputs -> pure-JAX fallback.
    out3 = jax.block_until_ready(focal_loss(x1, t1))
    assert jnp.allclose(out3, ref1, rtol=1e-5, atol=1e-6), (out3, ref1)

    print("KERNEL_OK")
</pallas_src>

<mosaic_0001>
module attributes {stable_mosaic.version = 11 : i64} {
  func.func @kernel(%arg0: i32, %arg1: i32, %arg2: memref<16x128xf32, #tpu.memory_space<vmem>>, %arg3: memref<16x128xf32, #tpu.memory_space<vmem>>, %arg4: memref<1x8x128xf32, #tpu.memory_space<vmem>>) attributes {dimension_semantics = [#tpu.dimension_semantics<parallel>, #tpu.dimension_semantics<arbitrary>], iteration_bounds = array<i64: 1, 1>, scalar_prefetch = 0 : i64, scratch_operands = 0 : i64, tpu.core_type = #tpu.core_type<tc>, window_params = [{transform_indices = @transform_0, window_bounds = array<i64: 16, 128>}, {transform_indices = @transform_1, window_bounds = array<i64: 16, 128>}, {transform_indices = @transform_2, window_bounds = array<i64: 1, 8, 128>}]} {
    %c0_i32 = arith.constant 0 : i32
    %0 = arith.cmpi eq, %arg1, %c0_i32 : i32
    %1 = arith.extui %0 : i1 to i32
    %c0_i32_0 = arith.constant 0 : i32
    %2 = arith.cmpi ne, %1, %c0_i32_0 : i32
    scf.if %2 {
      %cst_12 = arith.constant 0.000000e+00 : f32
      %23 = vector.broadcast %cst_12 : f32 to vector<1x8x128xf32>
      %c0_13 = arith.constant 0 : index
      %c0_14 = arith.constant 0 : index
      %c0_15 = arith.constant 0 : index
      %24 = vector.load %arg4[%c0_13, %c0_14, %c0_15] : memref<1x8x128xf32, #tpu.memory_space<vmem>>, vector<1x8x128xf32>
      tpu.vector_store %arg4[%c0_13, %c0_14, %c0_15], %23 {strides = array<i32>} : memref<1x8x128xf32, #tpu.memory_space<vmem>>, vector<1x8x128xf32>,
    } else {
    }
    %c0 = arith.constant 0 : index
    %c0_1 = arith.constant 0 : index
    %3 = vector.load %arg2[%c0, %c0_1] : memref<16x128xf32, #tpu.memory_space<vmem>>, vector<16x128xf32>
    %c0_2 = arith.constant 0 : index
    %c0_3 = arith.constant 0 : index
    %4 = vector.load %arg3[%c0_2, %c0_3] : memref<16x128xf32, #tpu.memory_space<vmem>>, vector<16x128xf32>
    %cst = arith.constant 0.000000e+00 : f32
    %5 = vector.broadcast %cst : f32 to vector<16x128xf32>
    %6 = arith.maximumf %3, %5 : vector<16x128xf32>
    %7 = arith.mulf %3, %4 : vector<16x128xf32>
    %8 = arith.subf %6, %7 : vector<16x128xf32>
    %9 = math.absf %3 : vector<16x128xf32>
    %cst_4 = arith.constant 0.000000e+00 : f32
    %10 = vector.broadcast %cst_4 : f32 to vector<16x128xf32>
    %11 = arith.subf %10, %9 : vector<16x128xf32>
    %12 = math.exp %11 : vector<16x128xf32>
    %13 = math.log1p %12 : vector<16x128xf32>
    %14 = arith.addf %8, %13 : vector<16x128xf32>
    %c0_5 = arith.constant 0 : index
    %c0_6 = arith.constant 0 : index
    %c0_7 = arith.constant 0 : index
    %15 = vector.load %arg4[%c0_5, %c0_6, %c0_7] : memref<1x8x128xf32, #tpu.memory_space<vmem>>, vector<1x8x128xf32>
    %16 = vector.shape_cast %15 : vector<1x8x128xf32> to vector<8x128xf32>
    %17 = vector.shape_cast %14 : vector<16x128xf32> to vector<2x8x128xf32>
    %cst_8 = arith.constant dense<0.000000e+00> : vector<8x128xf32>
    %18 = vector.multi_reduction <add>, %17, %cst_8 [0] : vector<2x8x128xf32> to vector<8x128xf32>
    %19 = arith.addf %16, %18 : vector<8x128xf32>
    %c0_9 = arith.constant 0 : index
    %c0_10 = arith.constant 0 : index
    %c0_11 = arith.constant 0 : index
    %20 = vector.load %arg4[%c0_9, %c0_10, %c0_11] : memref<1x8x128xf32, #tpu.memory_space<vmem>>, vector<1x8x128xf32>
    %21 = vector.shape_cast %20 : vector<1x8x128xf32> to vector<8x128xf32>
    %22 = vector.shape_cast %19 : vector<8x128xf32> to vector<1x8x128xf32>
    tpu.vector_store %arg4[%c0_9, %c0_10, %c0_11], %22 {strides = array<i32>} : memref<1x8x128xf32, #tpu.memory_space<vmem>>, vector<1x8x128xf32>,
    return
  }
  func.func @transform_0(%arg0: i32, %arg1: i32) -> (i32, i32) {
    %c1_i32 = arith.constant 1 : i32
    %0 = arith.muli %arg0, %c1_i32 : i32
    %1 = arith.addi %0, %arg1 : i32
    %c0_i32 = arith.constant 0 : i32
    %c0_i32_0 = arith.constant 0 : i32
    return %1, %c0_i32 : i32, i32
  }
  func.func @transform_1(%arg0: i32, %arg1: i32) -> (i32, i32) {
    %c1_i32 = arith.constant 1 : i32
    %0 = arith.muli %arg0, %c1_i32 : i32
    %1 = arith.addi %0, %arg1 : i32
    %c0_i32 = arith.constant 0 : i32
    %c0_i32_0 = arith.constant 0 : i32
    return %1, %c0_i32 : i32, i32
  }
  func.func @transform_2(%arg0: i32, %arg1: i32) -> (i32, i32, i32) {
    %c0_i32 = arith.constant 0 : i32
    %c0_i32_0 = arith.constant 0 : i32
    %c0_i32_1 = arith.constant 0 : i32
    return %arg0, %c0_i32, %c0_i32_0 : i32, i32, i32
  }
}

</mosaic_0001>

<bundles_post_ra>
// kernel: tpu_custom_call.1
= control target key start
LH: loop header
LB: loop body
LE: loop exit
PB: predicated region body
PF: predicated region fallthrough
CT: control target
= control target key end

     0   :  { %7 = vsyncpa [#allocation3], 0  ;;  %s224_s0 = inlined_call_operand.hbm [shape: f32[16,128], index: 0, kind: input, shape index: {}]   ;;  %s225_s1 = inlined_call_operand.hbm [shape: f32[16,128], index: 1, kind: input, shape index: {}]   ;;  %s226_s2 = inlined_call_operand.hbm [shape: f32[1,8,128], index: 2, kind: output, shape index: {}]  }
   0x1   :  { %8 = vsyncpa [#allocation6], 0 }
   0x2   :  { %9 = vsyncpa [#allocation4], 0  ;;  %s195_s9 = smov [#allocation2]  }
   0x3   :  { %s19_s10 = sshll.u32 %s195_s9, 4  ;;  %s20_s10 = int_to_ptr.vmem [resolvable:$true] %s19_s10 }
   0x4   :  { %s137_s11 = scalar_lea.vmem %s20_s10, 256  ;;  %p142_p1 = scmp.lt.s32.totalorder %s20_s10, %s20_s10 }
   0x5   :  { %p138_p0 = scmp.ne.s32.totalorder %s20_s10, %s137_s11  ;;  %p143_p2 = scmp.lt.s32.totalorder %s137_s11, %s137_s11 }
   0x7   :  { %p144_p3 = por %p143_p2, %p142_p1 }
   0x9   :  { %p145_p4 = pnand %p144_p3, %p138_p0 }
   0xb   :  { %148 = shalt.err (!%p145_p4)
}
   0xc   :  { %s196_s12 = smov 128   ;;  %s197_s13 = smov 8  }
   0xd   :  { %25 = dma.hbm_to_vmem [thread:$0]  %s224_s0, 256, %s20_s10, [#allocation3], %s196_s12, %s196_s12, %s197_s13  }
   0xe   :  { %s198_s16 = smov [#allocation5]  }
   0xf   :  { %s35_s17 = sshll.u32 %s198_s16, 4  ;;  %s36_s17 = int_to_ptr.vmem [resolvable:$true] %s35_s17 }
  0x10   :  { %s157_s18 = scalar_lea.vmem %s36_s17, 256  ;;  %p162_p6 = scmp.lt.s32.totalorder %s36_s17, %s36_s17 }
  0x11   :  { %p158_p5 = scmp.ne.s32.totalorder %s36_s17, %s157_s18  ;;  %p163_p7 = scmp.lt.s32.totalorder %s157_s18, %s157_s18 }
  0x13   :  { %p164_p8 = por %p163_p7, %p162_p6 }
  0x15   :  { %p165_p9 = pnand %p164_p8, %p158_p5 }
  0x17   :  { %168 = shalt.err (!%p165_p9)
}
  0x18   :  { %41 = dma.hbm_to_vmem [thread:$0]  %s225_s1, 256, %s36_s17, [#allocation6], %s196_s12, %s196_s12, %s197_s13  }
  0x19   :  { %189 = dma.done.wait [#allocation3], 256  }
  0x1a   :  { %190 = vsyncadd [#allocation3], 4294967040 }
  0x1b   :  { %191 = dma.done.wait [#allocation6], 256  }
  0x1c   :  { %192 = vsyncadd [#allocation6], 4294967040  ;;  %v57_v0 = vld [vmem:[#allocation2] sm:$0xff]  ;;  %v58_v1 = vld [vmem:[#allocation2 + $0x8] sm:$0xff]  ;;  %s199_s0 = smov [#allocation7]  }
  0x1d   :  { %v67_v2 = vand.u32 2147483647, %v57_v0  ;;  %v68_v3 = vand.u32 2147483647, %v58_v1  ;;  %v59_v14 = vld [vmem:[#allocation5] sm:$0xff]  ;;  %v60_v15 = vld [vmem:[#allocation5 + $0x8] sm:$0xff] }
  0x1e   :  { %v61_v17 = vmax.f32 %v57_v0, 0.0  ;;  %v63_v18 = vmul.f32 %v59_v14, %v57_v0  ;;  %v62_v21 = vmax.f32 %v58_v1, 0.0  ;;  %v64_v22 = vmul.f32 %v60_v15, %v58_v1  ;;  %s105_s1 = sshll.u32 %s199_s0, 4  ;;  %s106_s1 = int_to_ptr.vmem [resolvable:$true] %s105_s1 }
  0x1f   :  { %v69_v4 = vsub.f32 0.0, %v67_v2  ;;  %v70_v5 = vsub.f32 0.0, %v68_v3  ;;  %s169_s21 = scalar_lea.vmem %s106_s1, 128  ;;  %p174_p11 = scmp.lt.s32.totalorder %s106_s1, %s106_s1 }
  0x20   :  { %v65_v26 = vsub.f32 %v61_v17, %v63_v18  ;;  %v66_v29 = vsub.f32 %v62_v21, %v64_v22  ;;  %p170_p10 = scmp.ne.s32.totalorder %s106_s1, %s169_s21  ;;  %p175_p12 = scmp.lt.s32.totalorder %s169_s21, %s169_s21 }
  0x21   :  { %v71_v6 = vmul.f32 1.442695, %v69_v4  ;;  %v73_v7 = vmul.f32 1.442695, %v70_v5 }
  0x22   :  { %p176_p13 = por %p175_p12, %p174_p11 }
  0x23   :  { %121 = vpow2.f32 %v71_v6 }
  0x24   :  { %123 = vpow2.f32 %v73_v7  ;;  %p177_p0 = pnand %p176_p13, %p170_p10 }
  0x30   :  { %v122_v8 = vpop.eup %121 }
  0x31   :  { %v124_v9 = vpop.eup %123  ;;  %v75_v10 = vadd.f32 1.0, %v122_v8  ;;  %v78_v12 = vmul.f32 -0.5, %v122_v8  ;;  %v81_v19 = vand.u32 2147483647, %v122_v8 }
  0x32   :  { %v84_v11 = vadd.f32 1.0, %v124_v9  ;;  %v87_v13 = vmul.f32 -0.5, %v124_v9  ;;  %v90_v23 = vand.u32 2147483647, %v124_v9 }
  0x33   :  { %125 = vlog2.f32 %v75_v10  ;;  %v79_v16 = vadd.f32 1.0, %v78_v12  ;;  %vm82_vm0 = vcmp.lt.f32.partialorder %v81_v19, 0.0004427343 }
  0x34   :  { %127 = vlog2.f32 %v84_v11  ;;  %v88_v20 = vadd.f32 1.0, %v87_v13  ;;  %vm91_vm1 = vcmp.lt.f32.partialorder %v90_v23, 0.0004427343 }
  0x35   :  { %v80_v24 = vmul.f32 %v122_v8, %v79_v16 }
  0x36   :  { %v89_v27 = vmul.f32 %v124_v9, %v88_v20 }
  0x40   :  { %v126_v25 = vpop.eup %125 }
  0x41   :  { %v128_v28 = vpop.eup %127  ;;  %v77_v30 = vmul.f32 0.6931472, %v126_v25 }
  0x42   :  { %v86_v31 = vmul.f32 0.6931472, %v128_v28 }
  0x43   :  { %v83_v32 = vsel %vm82_vm0, %v80_v24, %v77_v30 }
  0x44   :  { %v92_v33 = vsel %vm91_vm1, %v89_v27, %v86_v31  ;;  %v93_v34 = vadd.f32 %v83_v32, %v65_v26 }
  0x45   :  { %v94_v35 = vadd.f32 %v92_v33, %v66_v29 }
  0x47   :  { %v96_v36 = vadd.f32 %v94_v35, %v93_v34 }
  0x49   :  { %98 = vst [vmem:[#allocation7] sm:$0xff] %v96_v36 }
  0x4a   :  { %180 = shalt.err (!%p177_p0)
}
  0x4b   :  { %108 = dma.vmem_to_hbm [thread:$0]  %s106_s1, 128, %s226_s2, [#allocation4]  }
  0x4c   :  { %193 = dma.done.wait [#allocation4], 128  }
  0x4d   :  { %194 = vsyncadd [#allocation4], 4294967168 }
  0x4e   :  { %112 = vsyncpa [#allocation3], 1 }
  0x4f   :  { %113 = vsyncpa [#allocation6], 1 }
  0x50   :  { %114 = vsyncpa [#allocation4], 1 }

</bundles_post_ra>
